<compile_context>
chip_gen: v7x
topology: tpu7x:2x2x1
jax: 0.10.0
libtpu: 0.0.40
codegen_flags: <defaults>
</compile_context>

<pallas_src>
import functools

import numpy as np
import jax
import jax.numpy as jnp
from jax import lax
from jax.experimental import pallas as pl
from jax.experimental.pallas import tpu as pltpu


_VMEM_LIMIT = 64 * 1024 * 1024      # cap sized for v7x's 64 MiB physical VMEM
_TARGET_BLOCK_BYTES = 4 << 20       # ~4 MiB f32 working block per grid step


def _pick_tc(nc, hw):
    """Rows (N*C planes) per grid tile.

    Aim for a ~4 MiB f32 working block (amortizes the ~0.35 us per-step overhead
    for small H*W, stays well inside VMEM with double buffering + pool temporaries
    for large H*W), rounded to a multiple of 32 rows so f32/bf16/int8 blocks all
    satisfy native tiling, or the full N*C extent when that is smaller.
    """
    rows = max(_TARGET_BLOCK_BYTES // (hw * 4), 1)
    if rows >= nc:
        return nc
    return min(nc, max(32, (rows // 32) * 32))


def _pool_kernel(seed_ref, bm_ref, psum_ref, *, tc, nc, h, w, k):
    """Pass 1: int8 block mask + one f32 partial sum per grid tile."""
    hw = h * w
    pad_f = k // 2            # front pad of F.max_pool2d(padding=k//2)
    pad_b = k - 1 - pad_f     # back pad (== the [:-1, :-1] crop for even k)

    seed = seed_ref[...].astype(jnp.float32)          # (tc, hw), values in {0, 1}

    # Lane coordinate inside each image row; (1, hw) masks broadcast over sublanes.
    wc = lax.broadcasted_iota(jnp.int32, (1, hw), 1) % w

    def shift_lanes(a, s):
        # shifted[:, j] = a[:, j + s], zero-filled where j + s falls outside [0, hw)
        if s == 0:
            return a
        z = jnp.zeros((tc, abs(s)), jnp.float32)
        if s > 0:
            return jnp.concatenate([a[:, s:], z], axis=1)
        return jnp.concatenate([z, a[:, :hw + s]], axis=1)

    # --- separable max-pool, W direction.  One folded compare per shift kills
    #     lanes that wrapped across an image-row boundary. ---
    rowmax = seed
    for s in range(-pad_f, pad_b + 1):
        if s == 0:
            continue
        valid = (wc >= -s) if s < 0 else (wc < w - s)
        rowmax = jnp.maximum(rowmax, jnp.where(valid, shift_lanes(seed, s), 0.0))

    # --- H direction: a shift of s rows == s*w lanes; the zero fill already
    #     reproduces max_pool2d's zero padding, so no validity mask is needed. ---
    pooled = rowmax
    for s in range(-pad_f, pad_b + 1):
        if s == 0:
            continue
        pooled = jnp.maximum(pooled, shift_lanes(rowmax, s * w))
    # TODO(synk): a log2(k) prefix-max ladder would cut shift/max stages for large
    # block_size; for the typical k in {3..7} the gain is marginal, keep it simple.

    bm = 1.0 - pooled                                 # keep-mask in {0, 1}
    bm_ref[...] = bm.astype(bm_ref.dtype)

    # Per-tile partial sum; rows past N*C in a partial last tile must not count.
    if nc % tc != 0:
        row = lax.broadcasted_iota(jnp.int32, (tc, hw), 0) + pl.program_id(0) * tc
        bm = jnp.where(row < nc, bm, 0.0)
    psum_ref[...] = jnp.broadcast_to(jnp.sum(bm, keepdims=True), psum_ref.shape)


def _apply_kernel(x_ref, bm_ref, scale_ref, o_ref):
    """Pass 2: out = x * block_mask * scale, in x's dtype (bf16 stays bf16)."""
    dt = o_ref.dtype
    scale = scale_ref[...].astype(dt)                       # (1, 1), broadcasts
    keep = bm_ref[...].astype(jnp.float32).astype(dt)       # int8 {0,1} -> dt
    o_ref[...] = x_ref[...] * keep * scale


@functools.partial(jax.jit, static_argnames=("block_size",))
def _dropblock_forward(x, key, drop_prob, *, block_size):
    N, C, H, W = x.shape
    k = int(block_size)
    NC, HW = N * C, H * W

    # gamma = drop_prob / k^2 * prod_fs fs / (fs - k + 1)  (fs over spatial dims)
    gamma = drop_prob / (k * k)
    for fs in (H, W):
        gamma = gamma * (fs / (fs - k + 1))

    # Bernoulli(gamma) seed mask, streamed to the kernel as int8 (1 byte/elem).
    seed = jax.random.bernoulli(key, gamma, (NC, HW)).astype(jnp.int8)

    x2 = x.reshape(NC, HW)                     # free reshape of contiguous NCHW
    tc = _pick_tc(NC, HW)
    num_tiles = pl.cdiv(NC, tc)
    grid = (num_tiles,)

    # ---- pass 1: block mask (int8) + per-tile partial sums ----
    bm, psum = pl.pallas_call(
        functools.partial(_pool_kernel, tc=tc, nc=NC, h=H, w=W, k=k),
        out_shape=(jax.ShapeDtypeStruct((NC, HW), jnp.int8),
                   jax.ShapeDtypeStruct((num_tiles * 8, 128), jnp.float32)),
        grid=grid,
        in_specs=[pl.BlockSpec((tc, HW), lambda i: (i, 0))],
        out_specs=(pl.BlockSpec((tc, HW), lambda i: (i, 0)),
                   pl.BlockSpec((8, 128), lambda i: (i, 0))),
        compiler_params=pltpu.CompilerParams(
            dimension_semantics=("parallel",),
            vmem_limit_bytes=_VMEM_LIMIT),
    )(seed)

    # Global normalizer; guard the (astronomically unlikely) all-dropped case,
    # where the PyTorch reference would emit inf/NaN.
    total = jnp.sum(psum[::8, 0])
    scale = (jnp.float32(NC * HW) / jnp.maximum(total, 1.0)).reshape(1, 1)

    # ---- pass 2: out = x * block_mask * scale ----
    out2 = pl.pallas_call(
        _apply_kernel,
        out_shape=jax.ShapeDtypeStruct((NC, HW), x.dtype),
        grid=grid,
        in_specs=[pl.BlockSpec((tc, HW), lambda i: (i, 0)),    # x tile
                  pl.BlockSpec((tc, HW), lambda i: (i, 0)),    # block-mask tile
                  # NOTE: kept as a tiny (1,1) VMEM block (instead of an SMEM
                  # scalar) so the same code also runs under the interpret/CPU
                  # fallback used for validation; the extra per-step DMA is 4 B.
                  pl.BlockSpec((1, 1), lambda i: (0, 0))],     # global scale
        out_specs=pl.BlockSpec((tc, HW), lambda i: (i, 0)),
        compiler_params=pltpu.CompilerParams(
            dimension_semantics=("parallel",),
            vmem_limit_bytes=_VMEM_LIMIT),
    )(x2, bm, scale)

    return out2.reshape(N, C, H, W)


def dropblock_apply(x, key, drop_prob, block_size, *, training=True):
    """Functional equivalent of DropBlock.forward on NCHW activations."""
    if (not training) or float(drop_prob) == 0.0:
        return x
    return _dropblock_forward(x, key, jnp.float32(drop_prob),
                              block_size=int(block_size))


class DBLinearScheduler:
    """JAX/Pallas port of DBLinearSheduler (linear drop-prob schedule, no params)."""

    def __init__(self, block_size, total_steps, start_prob=0.0, stop_prob=0.2):
        self.block_size = int(block_size)
        self.drop_values = np.linspace(start=start_prob, stop=stop_prob,
                                       num=total_steps)
        self.drop_prob = float(start_prob)
        self.tmp_step = 0
        self.training = True

    def __call__(self, x, key, epoch=None):
        if epoch is not None:
            # Original used min(epoch, len(drop_values)), which can index one past
            # the end; clamp to the last valid entry instead.
            idx = min(int(epoch), len(self.drop_values) - 1)
            self.drop_prob = float(self.drop_values[idx])
        return dropblock_apply(x, key,
                               drop_prob=self.drop_prob,
                               block_size=self.block_size,
                               training=self.training)

    def step(self):
        if self.tmp_step < len(self.drop_values):
            self.drop_prob = float(self.drop_values[self.tmp_step])
        self.tmp_step += 1


# Alias matching the original (misspelled) PyTorch class name.
DBLinearSheduler = DBLinearScheduler


if __name__ == "__main__":
    key = jax.random.PRNGKey(0)
    kx, kd = jax.random.split(key)

    # Small NCHW activations consistent with the module.
    x = jax.random.normal(kx, (2, 4, 16, 16), dtype=jnp.float32)

    sched = DBLinearScheduler(block_size=5, total_steps=10,
                              start_prob=0.0, stop_prob=0.2)
    out = sched(x, kd, epoch=7)        # drop_prob = linspace(0, 0.2, 10)[7] ~= 0.156
    out = jax.block_until_ready(out)

    assert out.shape == x.shape and out.dtype == x.dtype
    assert bool(jnp.all(jnp.isfinite(out)))

    # Structural sanity checks on DropBlock semantics:
    #  (1) a plausible fraction of activations is zeroed (gamma ~= 0.011, k = 5
    #      => roughly 10-40% dropped at these shapes),
    #  (2) every kept activation equals x * (numel / sum(block_mask)), i.e. one
    #      common scale factor > 1.
    dropped = (out == 0.0)
    drop_frac = float(jnp.mean(dropped.astype(jnp.float32)))
    assert 0.01 < drop_frac < 0.95, f"unexpected drop fraction: {drop_frac}"

    kept = jnp.logical_not(dropped)
    ratio = jnp.where(kept, out / jnp.where(kept, x, 1.0), 0.0)
    scale_est = float(jnp.max(ratio))
    same_scale = bool(jnp.all(jnp.where(
        kept, jnp.abs(ratio - scale_est) < 1e-3 * scale_est, True)))
    assert scale_est > 1.0 and same_scale, "normalization scale mismatch"

    print("KERNEL_OK")
</pallas_src>

<mosaic_0001>
module attributes {stable_mosaic.version = 11 : i64} {
  func.func @_apply_kernel(%arg0: i32, %arg1: memref<8x256xf32, #tpu.memory_space<vmem>>, %arg2: memref<8x256xi8, #tpu.memory_space<vmem>>, %arg3: memref<1x1xf32, #tpu.memory_space<vmem>>, %arg4: memref<8x256xf32, #tpu.memory_space<vmem>>) attributes {dimension_semantics = [#tpu.dimension_semantics<parallel>], iteration_bounds = array<i64: 1>, scalar_prefetch = 0 : i64, scratch_operands = 0 : i64, tpu.core_type = #tpu.core_type<tc>, window_params = [{transform_indices = @transform_0, window_bounds = array<i64: 8, 256>}, {transform_indices = @transform_1, window_bounds = array<i64: 8, 256>}, {pipeline_mode = #tpu.pipeline_mode<synchronous>, transform_indices = @transform_2, window_bounds = array<i64: 1, 1>}, {transform_indices = @transform_3, window_bounds = array<i64: 8, 256>}]} {
    %c0 = arith.constant 0 : index
    %c0_0 = arith.constant 0 : index
    %0 = vector.load %arg3[%c0, %c0_0] : memref<1x1xf32, #tpu.memory_space<vmem>>, vector<1x1xf32>
    %c0_1 = arith.constant 0 : index
    %c0_2 = arith.constant 0 : index
    %1 = vector.load %arg2[%c0_1, %c0_2] : memref<8x256xi8, #tpu.memory_space<vmem>>, vector<8x256xi8>
    %2 = arith.sitofp %1 : vector<8x256xi8> to vector<8x256xf32>
    %c0_3 = arith.constant 0 : index
    %c0_4 = arith.constant 0 : index
    %3 = vector.load %arg1[%c0_3, %c0_4] : memref<8x256xf32, #tpu.memory_space<vmem>>, vector<8x256xf32>
    %4 = arith.mulf %3, %2 : vector<8x256xf32>
    %5 = vector.broadcast %0 : vector<1x1xf32> to vector<8x256xf32>
    %6 = arith.mulf %4, %5 : vector<8x256xf32>
    %c0_5 = arith.constant 0 : index
    %c0_6 = arith.constant 0 : index
    %7 = vector.load %arg4[%c0_5, %c0_6] : memref<8x256xf32, #tpu.memory_space<vmem>>, vector<8x256xf32>
    tpu.vector_store %arg4[%c0_5, %c0_6], %6 {strides = array<i32>} : memref<8x256xf32, #tpu.memory_space<vmem>>, vector<8x256xf32>,
    return
  }
  func.func @transform_0(%arg0: i32) -> (i32, i32) {
    %c0_i32 = arith.constant 0 : i32
    %c0_i32_0 = arith.constant 0 : i32
    return %arg0, %c0_i32 : i32, i32
  }
  func.func @transform_1(%arg0: i32) -> (i32, i32) {
    %c0_i32 = arith.constant 0 : i32
    %c0_i32_0 = arith.constant 0 : i32
    return %arg0, %c0_i32 : i32, i32
  }
  func.func @transform_2(%arg0: i32) -> (i32, i32) {
    %c0_i32 = arith.constant 0 : i32
    %c0_i32_0 = arith.constant 0 : i32
    %c0_i32_1 = arith.constant 0 : i32
    return %c0_i32, %c0_i32_0 : i32, i32
  }
  func.func @transform_3(%arg0: i32) -> (i32, i32) {
    %c0_i32 = arith.constant 0 : i32
    %c0_i32_0 = arith.constant 0 : i32
    return %arg0, %c0_i32 : i32, i32
  }
}

module attributes {stable_mosaic.version = 11 : i64} {
  func.func @_pool_kernel(%arg0: i32, %arg1: memref<8x256xi8, #tpu.memory_space<vmem>>, %arg2: memref<8x256xi8, #tpu.memory_space<vmem>>, %arg3: memref<8x128xf32, #tpu.memory_space<vmem>>) attributes {dimension_semantics = [#tpu.dimension_semantics<parallel>], iteration_bounds = array<i64: 1>, scalar_prefetch = 0 : i64, scratch_operands = 0 : i64, tpu.core_type = #tpu.core_type<tc>, window_params = [{transform_indices = @transform_0, window_bounds = array<i64: 8, 256>}, {transform_indices = @transform_1, window_bounds = array<i64: 8, 256>}, {transform_indices = @transform_2, window_bounds = array<i64: 8, 128>}]} {
    %c0 = arith.constant 0 : index
    %c0_0 = arith.constant 0 : index
    %0 = vector.load %arg1[%c0, %c0_0] : memref<8x256xi8, #tpu.memory_space<vmem>>, vector<8x256xi8>
    %1 = arith.sitofp %0 : vector<8x256xi8> to vector<8x256xf32>
    %2 = tpu.iota {dimensions = array<i32: 1>} : vector<1x256xi32>
    %c16_i32 = arith.constant 16 : i32
    %c0_i32 = arith.constant 0 : i32
    %3 = arith.cmpi eq, %c16_i32, %c0_i32 : i32
    %c1_i32 = arith.constant 1 : i32
    %4 = arith.select %3, %c1_i32, %c16_i32 : i32
    %5 = vector.broadcast %4 : i32 to vector<1x256xi32>
    %6 = arith.remsi %2, %5 : vector<1x256xi32>
    %c0_i32_1 = arith.constant 0 : i32
    %7 = vector.broadcast %c0_i32_1 : i32 to vector<1x256xi32>
    %8 = arith.cmpi ne, %6, %7 : vector<1x256xi32>
    %c0_i32_2 = arith.constant 0 : i32
    %9 = vector.broadcast %c0_i32_2 : i32 to vector<1x256xi32>
    %10 = arith.cmpi slt, %6, %9 : vector<1x256xi32>
    %c0_i32_3 = arith.constant 0 : i32
    %11 = arith.cmpi slt, %4, %c0_i32_3 : i32
    %12 = vector.broadcast %11 : i1 to vector<1x256xi1>
    %13 = vector.broadcast %12 : vector<1x256xi1> to vector<1x256xi1>
    %14 = arith.xori %10, %13 : vector<1x256xi1>
    %15 = arith.andi %14, %8 : vector<1x256xi1>
    %16 = vector.broadcast %4 : i32 to vector<1x256xi32>
    %17 = arith.addi %6, %16 : vector<1x256xi32>
    %18 = arith.select %15, %17, %6 : vector<1x256xi1>, vector<1x256xi32>
    %c2_i32 = arith.constant 2 : i32
    %19 = vector.broadcast %c2_i32 : i32 to vector<1x256xi32>
    %20 = arith.cmpi sge, %18, %19 : vector<1x256xi32>
    %cst = arith.constant 0.000000e+00 : f32
    %21 = vector.broadcast %cst : f32 to vector<8x2xf32>
    %22 = vector.extract_strided_slice %1 {offsets = [0, 0], sizes = [8, 254], strides = [1, 1]} : vector<8x256xf32> to vector<8x254xf32>
    %23 = tpu.concatenate %21, %22 in 1 : vector<8x2xf32>, vector<8x254xf32> -> vector<8x256xf32>
    %cst_4 = arith.constant 0.000000e+00 : f32
    %24 = vector.shape_cast %20 : vector<1x256xi1> to vector<1x256xi1>
    %25 = vector.broadcast %24 : vector<1x256xi1> to vector<8x256xi1>
    %26 = vector.broadcast %cst_4 : f32 to vector<8x256xf32>
    %27 = arith.select %25, %23, %26 : vector<8x256xi1>, vector<8x256xf32>
    %28 = arith.maximumf %1, %27 : vector<8x256xf32>
    %c1_i32_5 = arith.constant 1 : i32
    %29 = vector.broadcast %c1_i32_5 : i32 to vector<1x256xi32>
    %30 = arith.cmpi sge, %18, %29 : vector<1x256xi32>
    %cst_6 = arith.constant 0.000000e+00 : f32
    %31 = vector.broadcast %cst_6 : f32 to vector<8x1xf32>
    %32 = vector.extract_strided_slice %1 {offsets = [0, 0], sizes = [8, 255], strides = [1, 1]} : vector<8x256xf32> to vector<8x255xf32>
    %33 = tpu.concatenate %31, %32 in 1 : vector<8x1xf32>, vector<8x255xf32> -> vector<8x256xf32>
    %cst_7 = arith.constant 0.000000e+00 : f32
    %34 = vector.shape_cast %30 : vector<1x256xi1> to vector<1x256xi1>
    %35 = vector.broadcast %34 : vector<1x256xi1> to vector<8x256xi1>
    %36 = vector.broadcast %cst_7 : f32 to vector<8x256xf32>
    %37 = arith.select %35, %33, %36 : vector<8x256xi1>, vector<8x256xf32>
    %38 = arith.maximumf %28, %37 : vector<8x256xf32>
    %c15_i32 = arith.constant 15 : i32
    %39 = vector.broadcast %c15_i32 : i32 to vector<1x256xi32>
    %40 = arith.cmpi slt, %18, %39 : vector<1x256xi32>
    %cst_8 = arith.constant 0.000000e+00 : f32
    %41 = vector.broadcast %cst_8 : f32 to vector<8x1xf32>
    %42 = vector.extract_strided_slice %1 {offsets = [0, 1], sizes = [8, 255], strides = [1, 1]} : vector<8x256xf32> to vector<8x255xf32>
    %43 = tpu.concatenate %42, %41 in 1 : vector<8x255xf32>, vector<8x1xf32> -> vector<8x256xf32>
    %cst_9 = arith.constant 0.000000e+00 : f32
    %44 = vector.shape_cast %40 : vector<1x256xi1> to vector<1x256xi1>
    %45 = vector.broadcast %44 : vector<1x256xi1> to vector<8x256xi1>
    %46 = vector.broadcast %cst_9 : f32 to vector<8x256xf32>
    %47 = arith.select %45, %43, %46 : vector<8x256xi1>, vector<8x256xf32>
    %48 = arith.maximumf %38, %47 : vector<8x256xf32>
    %c14_i32 = arith.constant 14 : i32
    %49 = vector.broadcast %c14_i32 : i32 to vector<1x256xi32>
    %50 = arith.cmpi slt, %18, %49 : vector<1x256xi32>
    %cst_10 = arith.constant 0.000000e+00 : f32
    %51 = vector.broadcast %cst_10 : f32 to vector<8x2xf32>
    %52 = vector.extract_strided_slice %1 {offsets = [0, 2], sizes = [8, 254], strides = [1, 1]} : vector<8x256xf32> to vector<8x254xf32>
    %53 = tpu.concatenate %52, %51 in 1 : vector<8x254xf32>, vector<8x2xf32> -> vector<8x256xf32>
    %cst_11 = arith.constant 0.000000e+00 : f32
    %54 = vector.shape_cast %50 : vector<1x256xi1> to vector<1x256xi1>
    %55 = vector.broadcast %54 : vector<1x256xi1> to vector<8x256xi1>
    %56 = vector.broadcast %cst_11 : f32 to vector<8x256xf32>
    %57 = arith.select %55, %53, %56 : vector<8x256xi1>, vector<8x256xf32>
    %58 = arith.maximumf %48, %57 : vector<8x256xf32>
    %cst_12 = arith.constant 0.000000e+00 : f32
    %59 = vector.broadcast %cst_12 : f32 to vector<8x32xf32>
    %60 = vector.extract_strided_slice %58 {offsets = [0, 0], sizes = [8, 224], strides = [1, 1]} : vector<8x256xf32> to vector<8x224xf32>
    %61 = tpu.concatenate %59, %60 in 1 : vector<8x32xf32>, vector<8x224xf32> -> vector<8x256xf32>
    %62 = arith.maximumf %58, %61 : vector<8x256xf32>
    %cst_13 = arith.constant 0.000000e+00 : f32
    %63 = vector.broadcast %cst_13 : f32 to vector<8x16xf32>
    %64 = vector.extract_strided_slice %58 {offsets = [0, 0], sizes = [8, 240], strides = [1, 1]} : vector<8x256xf32> to vector<8x240xf32>
    %65 = tpu.concatenate %63, %64 in 1 : vector<8x16xf32>, vector<8x240xf32> -> vector<8x256xf32>
    %66 = arith.maximumf %62, %65 : vector<8x256xf32>
    %cst_14 = arith.constant 0.000000e+00 : f32
    %67 = vector.broadcast %cst_14 : f32 to vector<8x16xf32>
    %68 = vector.extract_strided_slice %58 {offsets = [0, 16], sizes = [8, 240], strides = [1, 1]} : vector<8x256xf32> to vector<8x240xf32>
    %69 = tpu.concatenate %68, %67 in 1 : vector<8x240xf32>, vector<8x16xf32> -> vector<8x256xf32>
    %70 = arith.maximumf %66, %69 : vector<8x256xf32>
    %cst_15 = arith.constant 0.000000e+00 : f32
    %71 = vector.broadcast %cst_15 : f32 to vector<8x32xf32>
    %72 = vector.extract_strided_slice %58 {offsets = [0, 32], sizes = [8, 224], strides = [1, 1]} : vector<8x256xf32> to vector<8x224xf32>
    %73 = tpu.concatenate %72, %71 in 1 : vector<8x224xf32>, vector<8x32xf32> -> vector<8x256xf32>
    %74 = arith.maximumf %70, %73 : vector<8x256xf32>
    %cst_16 = arith.constant 1.000000e+00 : f32
    %75 = vector.broadcast %cst_16 : f32 to vector<8x256xf32>
    %76 = arith.subf %75, %74 : vector<8x256xf32>
    %77 = arith.fptosi %76 : vector<8x256xf32> to vector<8x256xi8>
    %c0_17 = arith.constant 0 : index
    %c0_18 = arith.constant 0 : index
    %78 = vector.load %arg2[%c0_17, %c0_18] : memref<8x256xi8, #tpu.memory_space<vmem>>, vector<8x256xi8>
    tpu.vector_store %arg2[%c0_17, %c0_18], %77 {strides = array<i32>} : memref<8x256xi8, #tpu.memory_space<vmem>>, vector<8x256xi8>,
    %79 = vector.shape_cast %76 : vector<8x256xf32> to vector<1x8x256xf32>
    %cst_19 = arith.constant dense<0.000000e+00> : vector<1xf32>
    %80 = vector.multi_reduction <add>, %79, %cst_19 [1, 2] : vector<1x8x256xf32> to vector<1xf32>
    %81 = vector.shape_cast %80 : vector<1xf32> to vector<1x1x1xf32>
    %82 = vector.extract %81[0, 0, 0] : f32 from vector<1x1x1xf32>
    %83 = vector.broadcast %82 : f32 to vector<1x1xf32>
    %84 = vector.shape_cast %83 : vector<1x1xf32> to vector<1x1xf32>
    %85 = vector.broadcast %84 : vector<1x1xf32> to vector<8x128xf32>
    %c0_20 = arith.constant 0 : index
    %c0_21 = arith.constant 0 : index
    %86 = vector.load %arg3[%c0_20, %c0_21] : memref<8x128xf32, #tpu.memory_space<vmem>>, vector<8x128xf32>
    tpu.vector_store %arg3[%c0_20, %c0_21], %85 {strides = array<i32>} : memref<8x128xf32, #tpu.memory_space<vmem>>, vector<8x128xf32>,
    return
  }
  func.func @transform_0(%arg0: i32) -> (i32, i32) {
    %c0_i32 = arith.constant 0 : i32
    %c0_i32_0 = arith.constant 0 : i32
    return %arg0, %c0_i32 : i32, i32
  }
  func.func @transform_1(%arg0: i32) -> (i32, i32) {
    %c0_i32 = arith.constant 0 : i32
    %c0_i32_0 = arith.constant 0 : i32
    return %arg0, %c0_i32 : i32, i32
  }
  func.func @transform_2(%arg0: i32) -> (i32, i32) {
    %c0_i32 = arith.constant 0 : i32
    %c0_i32_0 = arith.constant 0 : i32
    return %arg0, %c0_i32 : i32, i32
  }
}

</mosaic_0001>

<bundles_post_ra>
// kernel: _dropblock_forward.3
= control target key start
LH: loop header
LB: loop body
LE: loop exit
PB: predicated region body
PF: predicated region fallthrough
CT: control target
= control target key end

     0   :  { %s221_s0 = inlined_call_operand.hbm [shape: f32[8,256], index: 0, kind: input, shape index: {}]   ;;  %s222_s1 = inlined_call_operand.hbm [shape: s8[8,256], index: 1, kind: input, shape index: {}]   ;;  %s223_s2 = inlined_call_operand.<no memory space> [shape: f32[1,1], index: 2, kind: input, shape index: {}]   ;;  %s224_s3 = inlined_call_operand.hbm [shape: f32[8,256], index: 3, kind: output, shape index: {}]  }
   0x1   :  { %v8_v0 = vstv %s223_s2 }
   0x2   :  { %9 = vst [vmem:[#allocation2] sm:$0x1] %v8_v0 }
   0x3   :  { %10 = vsyncpa [#allocation4], 0 }
   0x4   :  { %11 = vsyncpa [#allocation7], 0 }
   0x5   :  { %12 = vsyncpa [#allocation5], 0  ;;  %s158_s14 = smov [#allocation3]   ;;  %s159_s16 = smov [#allocation6]  }
   0x6   :  { %s19_s15 = sshll.u32 %s158_s14, 4  ;;  %s29_s17 = sshll.u32 %s159_s16, 4  ;;  %s20_s15 = int_to_ptr.vmem [resolvable:$true] %s19_s15  ;;  %s30_s17 = int_to_ptr.vmem [resolvable:$true] %s29_s17 }
   0x7   :  { %s86_s20 = scalar_lea.hbm %s221_s0, 256 }
   0x8   :  { %p87_p0 = scmp.ne.s32.totalorder %s221_s0, %s86_s20  ;;  %p90_p1 = scmp.lt.u32.totalorder %s86_s20, %s221_s0 }
   0xa   :  { %p92_p2 = pnand %p90_p1, %p87_p0 }
   0xc   :  { %95 = shalt.err (!%p92_p2)
}
   0xd   :  { %s96_s24 = scalar_lea.vmem %s20_s15, 256  ;;  %p101_p4 = scmp.lt.s32.totalorder %s20_s15, %s20_s15 }
   0xe   :  { %p97_p3 = scmp.ne.s32.totalorder %s20_s15, %s96_s24  ;;  %p102_p5 = scmp.lt.s32.totalorder %s96_s24, %s96_s24 }
  0x10   :  { %p103_p6 = por %p102_p5, %p101_p4 }
  0x12   :  { %p104_p7 = pnand %p103_p6, %p97_p3 }
  0x14   :  { %107 = shalt.err (!%p104_p7)
}
  0x15   :  { %22 = dma.hbm_to_vmem [thread:$0]  %s221_s0, 256, %s20_s15, [#allocation4]  }
  0x16   :  { %s108_s29 = scalar_lea.hbm %s222_s1, 64 }
  0x17   :  { %p109_p8 = scmp.ne.s32.totalorder %s222_s1, %s108_s29  ;;  %p112_p9 = scmp.lt.u32.totalorder %s108_s29, %s222_s1 }
  0x19   :  { %p114_p10 = pnand %p112_p9, %p109_p8 }
  0x1b   :  { %117 = shalt.err (!%p114_p10)
}
  0x1c   :  { %s118_s7 = scalar_lea.vmem %s30_s17, 64  ;;  %p123_p12 = scmp.lt.s32.totalorder %s30_s17, %s30_s17 }
  0x1d   :  { %p119_p11 = scmp.ne.s32.totalorder %s30_s17, %s118_s7  ;;  %p124_p13 = scmp.lt.s32.totalorder %s118_s7, %s118_s7 }
  0x1f   :  { %p125_p0 = por %p124_p13, %p123_p12 }
  0x21   :  { %p126_p1 = pnand %p125_p0, %p119_p11 }
  0x23   :  { %129 = shalt.err (!%p126_p1)
}
  0x24   :  { %32 = dma.hbm_to_vmem [thread:$0]  %s222_s1, 64, %s30_s17, [#allocation7]  }
  0x25   :  { %152 = dma.done.wait [#allocation4], 256  }
  0x26   :  { %153 = vsyncadd [#allocation4], 4294967040 }
  0x27   :  { %154 = dma.done.wait [#allocation7], 64  }
  0x28   :  { %155 = vsyncadd [#allocation7], 4294967232  ;;  %v160_v1 = vmov 0   ;;  %v80_v2 = vld [vmem:[#allocation2] ss:$0 sm:$0xff]  ;;  %v47_v8 = vld [vmem:[#allocation3] sm:$0xff] }
  0x29   :  { %85 = vset.pattern.permute.xlu0 %v160_v1  ;;  %v42_v3 = vld [vmem:[#allocation6] sm:$0xf]  ;;  %v48_v9 = vld [vmem:[#allocation3 + $0x8] sm:$0xff]  ;;  %s161_s9 = smov [#allocation8]  }
  0x2a   :  { %57 = vperm.xlu0 %85, %v80_v2   ;;  %v43_v4 = vunpack.c.0.s8 %v42_v3  ;;  %v44_v5 = vunpack.c.1.s8 %v42_v3  ;;  %s70_s10 = sshll.u32 %s161_s9, 4  ;;  %s71_s10 = int_to_ptr.vmem [resolvable:$true] %s70_s10 }
  0x2b   :  { %s130_s1 = scalar_lea.vmem %s71_s10, 256  ;;  %p135_p3 = scmp.lt.s32.totalorder %s71_s10, %s71_s10 }
  0x2c   :  { %v45_v6 = vcvt.s32.f32 %v43_v4  ;;  %v46_v7 = vcvt.s32.f32 %v44_v5  ;;  %p131_p2 = scmp.ne.s32.totalorder %s71_s10, %s130_s1  ;;  %p136_p4 = scmp.lt.s32.totalorder %s130_s1, %s130_s1 }
  0x2e   :  { %v49_v10 = vmul.f32 %v47_v8, %v45_v6  ;;  %v50_v11 = vmul.f32 %v48_v9, %v46_v7  ;;  %p137_p5 = por %p136_p4, %p135_p3 }
  0x30   :  { %p138_p6 = pnand %p137_p5, %p131_p2 }
  0xa9   :  { %v58_v12 = vpop.permute.xlu0 %57 }
  0xaa   :  { %v60_v13 = vmul.f32 %v58_v12, %v49_v10  ;;  %v61_v14 = vmul.f32 %v58_v12, %v50_v11 }
  0xac   :  { %62 = vst [vmem:[#allocation8] sm:$0xff] %v60_v13  ;;  %63 = vst [vmem:[#allocation8 + $0x8] sm:$0xff] %v61_v14 }
  0xad   :  { %141 = shalt.err (!%p138_p6)
}
  0xae   :  { %s142_s13 = scalar_lea.hbm %s224_s3, 256 }
  0xaf   :  { %p143_p7 = scmp.ne.s32.totalorder %s224_s3, %s142_s13  ;;  %p146_p8 = scmp.lt.u32.totalorder %s142_s13, %s224_s3 }
  0xb1   :  { %p148_p9 = pnand %p146_p8, %p143_p7 }
  0xb3   :  { %151 = shalt.err (!%p148_p9)
}
  0xb4   :  { %73 = dma.vmem_to_hbm [thread:$0]  %s71_s10, 256, %s224_s3, [#allocation5]  }
  0xb5   :  { %156 = dma.done.wait [#allocation5], 256  }
  0xb6   :  { %157 = vsyncadd [#allocation5], 4294967040 }
  0xb7   :  { %77 = vsyncpa [#allocation4], 1 }
  0xb8   :  { %78 = vsyncpa [#allocation7], 1 }
  0xb9   :  { %79 = vsyncpa [#allocation5], 1 }

// kernel: _dropblock_forward.2
= control target key start
LH: loop header
LB: loop body
LE: loop exit
PB: predicated region body
PF: predicated region fallthrough
CT: control target
= control target key end

     0   :  { %8 = vsyncpa [#allocation3], 0  ;;  %s389_s0 = inlined_call_operand.hbm [shape: s8[8,256], index: 0, kind: input, shape index: {}]   ;;  %s390_s1 = inlined_call_operand.hbm [shape: s8[8,256], index: 1, kind: output, shape index: {0}]   ;;  %s391_s2 = inlined_call_operand.hbm [shape: f32[8,128], index: 2, kind: output, shape index: {1}]  }
   0x1   :  { %9 = vsyncpa [#allocation4], 0 }
   0x2   :  { %10 = vsyncpa [#allocation7], 0  ;;  %s327_s9 = smov [#allocation2]   ;;  %s255_s13 = scalar_lea.hbm %s389_s0, 64 }
   0x3   :  { %s17_s10 = sshll.u32 %s327_s9, 4  ;;  %p256_p0 = scmp.ne.s32.totalorder %s389_s0, %s255_s13  ;;  %s18_s10 = int_to_ptr.vmem [resolvable:$true] %s17_s10 }
   0x4   :  { %p259_p1 = scmp.lt.u32.totalorder %s255_s13, %s389_s0 }
   0x6   :  { %p261_p2 = pnand %p259_p1, %p256_p0 }
   0x8   :  { %264 = shalt.err (!%p261_p2)
}
   0x9   :  { %s265_s18 = scalar_lea.vmem %s18_s10, 64  ;;  %p270_p4 = scmp.lt.s32.totalorder %s18_s10, %s18_s10 }
   0xa   :  { %p266_p3 = scmp.ne.s32.totalorder %s18_s10, %s265_s18  ;;  %p271_p5 = scmp.lt.s32.totalorder %s265_s18, %s265_s18 }
   0xc   :  { %p272_p6 = por %p271_p5, %p270_p4 }
   0xe   :  { %p273_p7 = pnand %p272_p6, %p266_p3 }
  0x10   :  { %276 = shalt.err (!%p273_p7)
}
  0x11   :  { %20 = dma.hbm_to_vmem [thread:$0]  %s389_s0, 64, %s18_s10, [#allocation3]  }
  0x12   :  { %321 = dma.done.wait [#allocation3], 64  }
  0x13   :  { %322 = vsyncadd [#allocation3], 4294967232  ;;  %v24_v0 = vld [vmem:[#allocation2] sm:$0xf]  ;;  %s328_s21 = smov 1   ;;  %s329_s22 = smov 2   ;;  %v29_v5 = vlaneseq }
  0x14   :  { %v25_v1 = vunpack.c.0.s8 %v24_v0  ;;  %v26_v2 = vunpack.c.1.s8 %v24_v0  ;;  %s330_s23 = smov 127   ;;  %s331_s24 = smov 126   ;;  %vm64_vm0 = vcmask 15360   ;;  %vm83_vm3 = vcmask 7168  }
  0x15   :  { %v30_v6 = vand.u32 127, %v29_v5  ;;  %vm102_vm6 = vcmask 1039360   ;;  %vm121_vm9 = vcmask 1031168   ;;  %s332_s0 = smov 32   ;;  %s333_s25 = smov 16   ;;  %vm140_vm12 = vcmask 261120  }
  0x16   :  { %v27_v3 = vcvt.s32.f32 %v25_v1  ;;  %v28_v4 = vcvt.s32.f32 %v26_v2  ;;  %s334_s26 = smov 112   ;;  %s335_s27 = smov 96   ;;  %vm151_vm13 = vcmask 130048   ;;  %vm162_vm14 = vcmask 916480  }
  0x17   :  { %v31_v7 = vadd.s32 128, %v30_v6  ;;  %v36_v8 = vand.u32 15, %v30_v6  ;;  %vm173_vm15 = vcmask 785408   ;;  %s336_s28 = smov [#allocation5]  }
  0x18   :  { %79 = vrot.lane.b32.xlu1 %v27_v3, %s328_s21  ;;  %60 = vrot.lane.b32.xlu0 %v27_v3, %s329_s22  ;;  %s219_s29 = sshll.u32 %s336_s28, 4  ;;  %s220_s29 = int_to_ptr.vmem [resolvable:$true] %s219_s29 }
  0x19   :  { %v43_v9 = vand.u32 15, %v31_v7  ;;  %vm56_vm1 = vcmp.ge.s32.totalorder %v36_v8, 2  ;;  %vm77_vm5 = vcmp.ge.s32.totalorder %v36_v8, 1  ;;  %vm96_vm7 = vcmp.lt.s32.totalorder %v36_v8, 15  ;;  %s277_s30 = scalar_lea.vmem %s220_s29, 64  ;;  %p282_p9 = scmp.lt.s32.totalorder %s220_s29, %s220_s29 }
  0x1a   :  { %vm115_vm11 = vcmp.lt.s32.totalorder %v36_v8, 14  ;;  %p278_p8 = scmp.ne.s32.totalorder %s220_s29, %s277_s30  ;;  %p283_p10 = scmp.lt.s32.totalorder %s277_s30, %s277_s30 }
  0x1b   :  { %vm57_vm2 = vcmp.ge.s32.totalorder %v43_v9, 2  ;;  %vm78_vm4 = vcmp.ge.s32.totalorder %v43_v9, 1  ;;  %vm97_vm8 = vcmp.lt.s32.totalorder %v43_v9, 15  ;;  %vm116_vm10 = vcmp.lt.s32.totalorder %v43_v9, 14 }
  0x1c   :  { %81 = vrot.lane.b32.xlu1 %v28_v4, %s328_s21  ;;  %62 = vrot.lane.b32.xlu0 %v28_v4, %s329_s22  ;;  %p284_p11 = por %p283_p10, %p282_p9 }
  0x1e   :  { %p285_p12 = pnand %p284_p11, %p278_p8 }
  0x20   :  { %100 = vrot.lane.b32.xlu1 %v28_v4, %s330_s23  ;;  %98 = vrot.lane.b32.xlu0 %v27_v3, %s330_s23 }
  0x24   :  { %119 = vrot.lane.b32.xlu1 %v28_v4, %s331_s24  ;;  %117 = vrot.lane.b32.xlu0 %v27_v3, %s331_s24 }
  0x8a   :  { %v80_v10 = vpop.permute.xlu1 %79  ;;  %v61_v11 = vpop.permute.xlu0 %60 }
  0x8b   :  { %v68_v12 = vsel %vm64_vm0, 0.0, %v61_v11  ;;  %v87_v19 = vsel %vm83_vm3, 0.0, %v80_v10 }
  0x8c   :  { %v73_v13 = vsel %vm56_vm1, %v68_v12, 0.0  ;;  %v92_v28 = vsel %vm77_vm5, %v87_v19, 0.0 }
  0x8d   :  { %v75_v20 = vmax.f32 %v27_v3, %v73_v13 }
  0x8e   :  { %v82_v14 = vpop.permute.xlu1 %81  ;;  %v63_v15 = vpop.permute.xlu0 %62 }
  0x8f   :  { %v84_v16 = vsel %vm83_vm3, %v80_v10, %v82_v14  ;;  %v65_v17 = vsel %vm64_vm0, %v61_v11, %v63_v15  ;;  %v94_v31 = vmax.f32 %v75_v20, %v92_v28 }
  0x90   :  { %v74_v18 = vsel %vm57_vm2, %v65_v17, 0.0  ;;  %v93_v22 = vsel %vm78_vm4, %v84_v16, 0.0 }
  0x91   :  { %v76_v21 = vmax.f32 %v28_v4, %v74_v18 }
  0x92   :  { %v101_v23 = vpop.permute.xlu1 %100  ;;  %v99_v24 = vpop.permute.xlu0 %98 }
  0x93   :  { %v95_v25 = vmax.f32 %v76_v21, %v93_v22  ;;  %v106_v26 = vsel %vm102_vm6, %v101_v23, 0.0  ;;  %v103_v27 = vsel %vm102_vm6, %v99_v24, %v101_v23 }
  0x94   :  { %v112_v29 = vsel %vm97_vm8, %v106_v26, 0.0  ;;  %v111_v30 = vsel %vm96_vm7, %v103_v27, 0.0 }
  0x95   :  { %v114_v34 = vmax.f32 %v95_v25, %v112_v29  ;;  %v113_v35 = vmax.f32 %v94_v31, %v111_v30 }
  0x96   :  { %v120_v32 = vpop.permute.xlu1 %119  ;;  %v118_v33 = vpop.permute.xlu0 %117 }
  0x97   :  { %v125_v36 = vsel %vm121_vm9, %v120_v32, 0.0  ;;  %v122_v37 = vsel %vm121_vm9, %v118_v33, %v120_v32 }
  0x98   :  { %v131_v38 = vsel %vm116_vm10, %v125_v36, 0.0  ;;  %v130_v39 = vsel %vm115_vm11, %v122_v37, 0.0 }
  0x99   :  { %v133_v40 = vmax.f32 %v114_v34, %v131_v38  ;;  %v132_v41 = vmax.f32 %v113_v35, %v130_v39 }
  0x9b   :  { %138 = vrot.lane.b32.xlu1 %v133_v40, %s332_s0  ;;  %136 = vrot.lane.b32.xlu0 %v132_v41, %s332_s0 }
  0x9f   :  { %149 = vrot.lane.b32.xlu1 %v133_v40, %s333_s25  ;;  %147 = vrot.lane.b32.xlu0 %v132_v41, %s333_s25 }
  0xa3   :  { %160 = vrot.lane.b32.xlu1 %v133_v40, %s334_s26  ;;  %158 = vrot.lane.b32.xlu0 %v132_v41, %s334_s26 }
  0xa7   :  { %171 = vrot.lane.b32.xlu1 %v133_v40, %s335_s27  ;;  %169 = vrot.lane.b32.xlu0 %v132_v41, %s335_s27 }
 0x10d   :  { %v139_v42 = vpop.permute.xlu1 %138  ;;  %v137_v43 = vpop.permute.xlu0 %136 }
 0x10e   :  { %v141_v46 = vsel %vm140_vm12, %v137_v43, %v139_v42  ;;  %v144_v47 = vsel %vm140_vm12, 0.0, %v137_v43 }
 0x10f   :  { %v145_v50 = vmax.f32 %v132_v41, %v144_v47  ;;  %v146_v51 = vmax.f32 %v133_v40, %v141_v46 }
 0x111   :  { %v150_v44 = vpop.permute.xlu1 %149  ;;  %v148_v45 = vpop.permute.xlu0 %147 }
 0x112   :  { %v152_v48 = vsel %vm151_vm13, %v148_v45, %v150_v44  ;;  %v155_v49 = vsel %vm151_vm13, 0.0, %v148_v45 }
 0x113   :  { %v156_v56 = vmax.f32 %v145_v50, %v155_v49  ;;  %v157_v57 = vmax.f32 %v146_v51, %v152_v48 }
 0x115   :  { %v161_v52 = vpop.permute.xlu1 %160  ;;  %v159_v53 = vpop.permute.xlu0 %158 }
 0x116   :  { %v166_v54 = vsel %vm162_vm14, %v161_v52, 0.0  ;;  %v163_v55 = vsel %vm162_vm14, %v159_v53, %v161_v52 }
 0x117   :  { %v168_v58 = vmax.f32 %v157_v57, %v166_v54  ;;  %v167_v59 = vmax.f32 %v156_v56, %v163_v55 }
 0x119   :  { %v172_v60 = vpop.permute.xlu1 %171  ;;  %v170_v61 = vpop.permute.xlu0 %169 }
 0x11a   :  { %v177_v62 = vsel %vm173_vm15, %v172_v60, 0.0  ;;  %v174_v63 = vsel %vm173_vm15, %v170_v61, %v172_v60 }
 0x11b   :  { %v179_v0 = vmax.f32 %v168_v58, %v177_v62  ;;  %v178_v1 = vmax.f32 %v167_v59, %v174_v63 }
 0x11d   :  { %v181_v2 = vsub.f32 1.0, %v179_v0  ;;  %v180_v3 = vsub.f32 1.0, %v178_v1 }
 0x11f   :  { %v183_v4 = vtrunc.f32 %v181_v2  ;;  %v182_v5 = vtrunc.f32 %v180_v3  ;;  %v201_v6 = vadd.f32 %v181_v2, %v180_v3 }
 0x121   :  { %v190_v7 = vpack.c.f32.eXmY %v183_v4, %v183_v4, 312  ;;  %v184_v8 = vpack.c.f32.eXmY %v182_v5, %v182_v5, 312  ;;  %202 = vadd.xlane.f32.xlu0 %v201_v6 }
 0x123   :  { %v194_v9 = vpack.c.b8 %v190_v7, %v190_v7  ;;  %v188_v10 = vpack.c.b8 %v184_v8, %v184_v8 }
 0x125   :  { %v197_v11 = vunpack.c.0.s8 %v194_v9  ;;  %v196_v12 = vunpack.c.0.s8 %v188_v10 }
 0x127   :  { %v198_v13 = vpack.c.b16 %v197_v11, %v196_v12 }
 0x129   :  { %v199_v14 = vpack.c.b8 %v198_v13, %v198_v13 }
 0x12b   :  { %200 = vst [vmem:[#allocation5] sm:$0xf] %v199_v14 }
 0x12c   :  { %288 = shalt.err (!%p285_p12)
}
 0x12d   :  { %s289_s5 = scalar_lea.hbm %s390_s1, 64 }
 0x12e   :  { %p290_p13 = scmp.ne.s32.totalorder %s390_s1, %s289_s5  ;;  %p293_p0 = scmp.lt.u32.totalorder %s289_s5, %s390_s1 }
 0x130   :  { %p295_p1 = pnand %p293_p0, %p290_p13 }
 0x132   :  { %298 = shalt.err (!%p295_p1)
}
 0x133   :  { %222 = dma.vmem_to_hbm [thread:$0]  %s220_s29, 64, %s390_s1, [#allocation4]  }
 0x134   :  { %s337_s12 = smov [#allocation6]  }
 0x135   :  { %s229_s13 = sshll.u32 %s337_s12, 4  ;;  %s230_s13 = int_to_ptr.vmem [resolvable:$true] %s229_s13 }
 0x136   :  { %s299_s15 = scalar_lea.vmem %s230_s13, 128  ;;  %p304_p3 = scmp.lt.s32.totalorder %s230_s13, %s230_s13 }
 0x137   :  { %p300_p2 = scmp.ne.s32.totalorder %s230_s13, %s299_s15  ;;  %p305_p4 = scmp.lt.s32.totalorder %s299_s15, %s299_s15 }
 0x139   :  { %p306_p5 = por %p305_p4, %p304_p3 }
 0x13b   :  { %p307_p6 = pnand %p306_p5, %p300_p2 }
 0x1ae   :  { %v203_v15 = vpop.xlane.xlu0 %202 }
 0x1af   :  { %v204_v16 = vrot.slane %v203_v15, 4 }
 0x1b1   :  { %v205_v17 = vadd.f32 %v204_v16, %v203_v15 }
 0x1b3   :  { %v206_v18 = vrot.slane %v205_v17, 2 }
 0x1b5   :  { %v207_v19 = vadd.f32 %v206_v18, %v205_v17 }
 0x1b7   :  { %v208_v20 = vrot.slane %v207_v19, 1 }
 0x1b9   :  { %v209_v21 = vadd.f32 %v208_v20, %v207_v19 }
 0x1bb   :  { %242 = vpush %v209_v21 }
 0x1ec   :  { %s243_s14 = spop %242 }
 0x1ed   :  { %v211_v22 = vstv %s243_s14 }
 0x1ee   :  { %212 = vst [vmem:[#allocation6] sm:$0xff] %v211_v22 }
 0x1ef   :  { %310 = shalt.err (!%p307_p6)
}
 0x1f0   :  { %s311_s17 = scalar_lea.hbm %s391_s2, 128 }
 0x1f1   :  { %p312_p7 = scmp.ne.s32.totalorder %s391_s2, %s311_s17  ;;  %p315_p8 = scmp.lt.u32.totalorder %s311_s17, %s391_s2 }
 0x1f3   :  { %p317_p9 = pnand %p315_p8, %p312_p7 }
 0x1f5   :  { %320 = shalt.err (!%p317_p9)
}
 0x1f6   :  { %232 = dma.vmem_to_hbm [thread:$0]  %s230_s13, 128, %s391_s2, [#allocation7]  }
 0x1f7   :  { %323 = dma.done.wait [#allocation4], 64  }
 0x1f8   :  { %324 = vsyncadd [#allocation4], 4294967232 }
 0x1f9   :  { %325 = dma.done.wait [#allocation7], 128  }
 0x1fa   :  { %326 = vsyncadd [#allocation7], 4294967168 }
 0x1fb   :  { %239 = vsyncpa [#allocation3], 1 }
 0x1fc   :  { %240 = vsyncpa [#allocation4], 1 }
 0x1fd   :  { %241 = vsyncpa [#allocation7], 1 }

</bundles_post_ra>
